<compile_context>
chip_gen: v5e
topology: v5e:2x2
jax: 0.10.0
libtpu: 0.0.40
codegen_flags: <defaults>
</compile_context>

<pallas_src>
import numpy as np
import jax
import jax.numpy as jnp
from jax.experimental import pallas as pl
from jax.experimental.pallas import tpu as pltpu

EPS = 1e-12  # matches torch F.normalize eps


def _round_up(x, m):
    return ((x + m - 1) // m) * m


# ----------------------------------------------------------------------------
# Stage 1: fold Householder reflections + diag(s) + v into one (K, D) matrix.
# ----------------------------------------------------------------------------
def _householder_left(m, vcol):
    # m: (K, D) f32, vcol: (K, 1) f32.  Computes (I - 2 vhat vhat^T) @ m.
    norm = jnp.sqrt(jnp.sum(vcol * vcol))
    vhat = vcol / jnp.maximum(norm, EPS)          # F.normalize(vec, p=2, dim=-1)
    proj = jnp.sum(m * vhat, axis=0, keepdims=True)            # (1, D)
    return m - 2.0 * vhat * proj


def _make_fold_kernel(n_left, n_right):
    def fold_kernel(left_ref, s_ref, right_ref, v_ref, m_ref):
        # weight_table = u @ H_L1 @ H_L2 @ diag(s) @ H_R1 @ H_R2 @ v == u @ M,
        #   M = H_L1 H_L2 diag(s) H_R1 H_R2 v,
        # built by applying factors right-to-left to v (rank-1 updates).
        # TODO(synk): one-time cost; if this ever runs per training step, feed
        # the vectors lane-dense and use an MXU matvec instead of the XLU
        # axis-0 reduce.
        m = v_ref[...].astype(jnp.float32)                      # (K, D)
        right = right_ref[...].astype(jnp.float32)              # (K, nR)
        left = left_ref[...].astype(jnp.float32)                # (K, nL)
        for i in range(n_right - 1, -1, -1):                    # rightmost first
            m = _householder_left(m, right[:, i:i + 1])
        m = s_ref[...].astype(jnp.float32) * m                  # diag(s) @ m
        for i in range(n_left - 1, -1, -1):
            m = _householder_left(m, left[:, i:i + 1])
        m_ref[...] = m.astype(m_ref.dtype)
    return fold_kernel


def fold_projection(left, s, right, v):
    """Returns M (K, D) f32 such that  u @ M == reconstructed embedding table."""
    K, D = v.shape
    n_left, n_right = int(left.shape[0]), int(right.shape[0])
    # Columns of left_t / right_t are the Householder vectors: shape (K, n).
    left_t = (left.T if n_left else jnp.zeros((K, 1), jnp.float32)).astype(jnp.float32)
    right_t = (right.T if n_right else jnp.zeros((K, 1), jnp.float32)).astype(jnp.float32)
    s_col = s.reshape(K, 1).astype(jnp.float32)
    lw, rw = int(left_t.shape[1]), int(right_t.shape[1])
    return pl.pallas_call(
        _make_fold_kernel(n_left, n_right),
        out_shape=jax.ShapeDtypeStruct((K, D), jnp.float32),
        grid_spec=pltpu.PrefetchScalarGridSpec(
            num_scalar_prefetch=0,
            grid=(1,),
            in_specs=[
                pl.BlockSpec((K, lw), lambda i: (0, 0)),
                pl.BlockSpec((K, 1), lambda i: (0, 0)),
                pl.BlockSpec((K, rw), lambda i: (0, 0)),
                pl.BlockSpec((K, D), lambda i: (0, 0)),
            ],
            out_specs=pl.BlockSpec((K, D), lambda i: (0, 0)),
        ),
    )(left_t, s_col, right_t, v.astype(jnp.float32))


# ----------------------------------------------------------------------------
# Stage 2: weight = u @ M, tiled MXU matmul (bf16 in, f32 acc, bf16 table out).
# ----------------------------------------------------------------------------
def _matmul_kernel(u_ref, m_ref, out_ref):
    out_ref[...] = jnp.dot(
        u_ref[...], m_ref[...],
        preferred_element_type=jnp.float32).astype(out_ref.dtype)


def reconstruct_weight(u, m, *, row_tile=256, d_tile=512,
                       out_dtype=jnp.bfloat16):
    """weight = u @ M.

    u/m are fed in their stored dtype (bf16 recommended) with f32 accumulation.
    M is tiled along D (grid axis) so resident VMEM stays bounded regardless of
    K*D (required on v7x: 64 MiB physical / 32 MiB scoped; also helps v5e's
    16 MiB scoped default).  row_tile=256 keeps the 256-wide v6e/v7x MXU full;
    use row_tile=128 on v5e (128-wide MXU) to halve the u/out tile VMEM.
    """
    N, K = u.shape
    Km, D = m.shape
    assert Km == K
    tn = N if N <= row_tile else row_tile        # full dim or multiple of 8
    td = D if D <= d_tile else d_tile            # full dim or multiple of 128
    return pl.pallas_call(
        _matmul_kernel,
        out_shape=jax.ShapeDtypeStruct((N, D), out_dtype),
        grid_spec=pltpu.PrefetchScalarGridSpec(
            num_scalar_prefetch=0,
            grid=(pl.cdiv(N, tn), pl.cdiv(D, td)),
            in_specs=[
                pl.BlockSpec((tn, K), lambda i, j: (i, 0)),
                pl.BlockSpec((K, td), lambda i, j: (0, j)),
            ],
            out_specs=pl.BlockSpec((tn, td), lambda i, j: (i, j)),
        ),
        compiler_params=pltpu.CompilerParams(
            dimension_semantics=("parallel", "parallel"),
            vmem_limit_bytes=48 * 1024 * 1024),
    )(u, m)


# ----------------------------------------------------------------------------
# Stage 3a: VMEM-resident gather (small tables) — exact one-hot MXU matmul.
# ----------------------------------------------------------------------------
def _make_resident_gather_kernel(n_chunk):
    def gather_kernel(ids_ref, w_ref, out_ref):
        ids = ids_ref[...]                         # (tt, 1) int32
        tt = ids.shape[0]
        N, D = w_ref.shape
        acc = jnp.zeros((tt, D), jnp.float32)
        # One-hot matmul gather, chunked over N to bound vreg pressure.  Exact:
        # each one-hot row has a single 1, so the MXU sum selects one table row.
        for n0 in range(0, N, n_chunk):
            n1 = min(n0 + n_chunk, N)
            tab = w_ref[n0:n1, :]                  # static slice of the VMEM ref
            col = jax.lax.broadcasted_iota(jnp.int32, (tt, n1 - n0), 1) + n0
            onehot = (col == ids).astype(tab.dtype)
            acc = acc + jnp.dot(onehot, tab, preferred_element_type=jnp.float32)
        out_ref[...] = acc.astype(out_ref.dtype)
    return gather_kernel


def _resident_gather(weight, ids, *, token_tile=128, n_chunk=256):
    N, D = weight.shape
    ids_flat = ids.reshape(-1).astype(jnp.int32)
    T = int(ids_flat.shape[0])
    tt = min(_round_up(token_tile, 8), _round_up(T, 8))
    t_pad = _round_up(T, tt)
    if t_pad != T:
        ids_flat = jnp.pad(ids_flat, (0, t_pad - T))   # pad rows -> discarded
    ids2 = ids_flat.reshape(t_pad, 1)
    out = pl.pallas_call(
        _make_resident_gather_kernel(n_chunk),
        out_shape=jax.ShapeDtypeStruct((t_pad, D), weight.dtype),
        grid_spec=pltpu.PrefetchScalarGridSpec(
            num_scalar_prefetch=0,
            grid=(t_pad // tt,),
            in_specs=[
                pl.BlockSpec((tt, 1), lambda t: (t, 0)),
                pl.BlockSpec((N, D), lambda t: (0, 0)),   # table resident in VMEM
            ],
            out_specs=pl.BlockSpec((tt, D), lambda t: (t, 0)),
        ),
        # Token tiles are independent -> megacore-safe; both v7x TCs are used.
        compiler_params=pltpu.CompilerParams(
            dimension_semantics=("parallel",)),
    )(ids2, weight)
    return out[:T].reshape(ids.shape + (D,))


# ----------------------------------------------------------------------------
# Stage 3b: manual-DMA gather for large tables (table stays in HBM).
# ----------------------------------------------------------------------------
def _make_dma_gather_kernel(token_tile):
    tt = token_tile

    def gather_kernel(ids_ref, w_hbm, out_ref, wbuf, sem):
        t = pl.program_id(0)
        nt = pl.num_programs(0)

        def issue(tile_idx, slot):
            base = tile_idx * tt
            off = slot * tt

            def body(j, carry):
                row = ids_ref[base + j]
                # TODO(synk): ids are not range-checked; an out-of-range id is a
                # device DMA fault rather than PyTorch's index error.
                pltpu.make_async_copy(
                    w_hbm.at[pl.ds(row, 1)],
                    wbuf.at[pl.ds(off + j, 1)],
                    sem.at[slot]).start()
                return carry

            # Unrolled issue loop: overlaps SMEM id reads, address math and
            # descriptor pushes instead of serializing them.
            jax.lax.fori_loop(0, tt, body, 0, unroll=8)

        @pl.when(t == 0)
        def _():
            issue(0, 0)                       # prime buffer 0

        slot = t % 2

        # Prefetch the next token tile into the other buffer half before we
        # block on the current one (double buffering across grid steps).
        # NOTE: relies on strictly sequential grid execution -> keep this grid
        # axis "arbitrary" (do not mark parallel/core_parallel).
        @pl.when(t + 1 < nt)
        def _():
            issue(t + 1, 1 - slot)

        # Aggregate wait: one (tt, D) descriptor drains the same byte count as
        # the tt per-row copies signalled on sem[slot] (DMA sems count bytes),
        # replacing tt sequential .wait() calls on the critical path.
        pltpu.make_async_copy(
            wbuf.at[pl.ds(0, tt)],
            wbuf.at[pl.ds(slot * tt, tt)],
            sem.at[slot]).wait()

        base = pl.multiple_of(slot * tt, 8)
        out_ref[...] = wbuf[pl.ds(base, tt), :]   # dense (tt, D) store
    return gather_kernel


def _dma_gather(weight, ids, *, token_tile=256):
    N, D = weight.shape
    ids_flat = ids.reshape(-1).astype(jnp.int32)
    T = int(ids_flat.shape[0])
    tt = min(_round_up(token_tile, 8), _round_up(T, 8))
    t_pad = _round_up(T, tt)
    if t_pad != T:
        ids_flat = jnp.pad(ids_flat, (0, t_pad - T))   # pad rows -> discarded
    out = pl.pallas_call(
        _make_dma_gather_kernel(tt),
        out_shape=jax.ShapeDtypeStruct((t_pad, D), weight.dtype),
        grid_spec=pltpu.PrefetchScalarGridSpec(
            num_scalar_prefetch=1,                         # ids -> SMEM
            grid=(t_pad // tt,),
            in_specs=[pl.BlockSpec(memory_space=pl.ANY)],  # table stays in HBM
            out_specs=pl.BlockSpec((tt, D), lambda t, ids: (t, 0)),
            scratch_shapes=[
                pltpu.VMEM((2 * tt, D), weight.dtype),     # double buffer
                pltpu.SemaphoreType.DMA((2,)),
            ],
        ),
        compiler_params=pltpu.CompilerParams(
            dimension_semantics=("arbitrary",)),
    )(ids_flat, weight)
    return out[:T].reshape(ids.shape + (D,))


_RESIDENT_MAX_BYTES = 1 << 20     # tables up to 1 MiB live in VMEM
_RESIDENT_MAX_ROWS = 8192


def embedding_gather(weight, ids, *, token_tile=256):
    # F.embedding forward == pure row gather (max_norm is None; padding_idx /
    # scale_grad_by_freq / sparse only affect gradients, not forward values).
    N, D = weight.shape
    table_bytes = N * D * jnp.dtype(weight.dtype).itemsize
    if table_bytes <= _RESIDENT_MAX_BYTES and N <= _RESIDENT_MAX_ROWS:
        return _resident_gather(weight, ids)
    return _dma_gather(weight, ids, token_tile=token_tile)


# ----------------------------------------------------------------------------
# Module wrapper
# ----------------------------------------------------------------------------
class ForwardEmbeddingPallas:
    """JAX/Pallas equivalent of ForwardEmbedding(HouseSvdEmbedding(...))."""

    def __init__(self, base_weight, *, sigma=True, left=2, right=2,
                 padding_idx=None, row_tile=256, d_tile=512, token_tile=256,
                 compute_dtype=jnp.bfloat16, weight_dtype=jnp.bfloat16):
        # SVD of the base embedding table (host-side glue, matches __init__).
        u, s, vh = np.linalg.svd(np.asarray(base_weight, np.float32),
                                 full_matrices=False)
        K = s.shape[0]
        # f32 master copies (reference semantics); kernels are fed compute_dtype.
        self.u = jnp.asarray(u, jnp.float32)          # (N, K)
        self.s = jnp.asarray(s, jnp.float32)          # (K,)  (trainable iff sigma)
        self.v = jnp.asarray(vh, jnp.float32)         # (K, D) == Vh
        init_vec = jnp.ones((K,), jnp.float32) / jnp.sqrt(jnp.float32(K))
        self.left = jnp.tile(init_vec[None, :], (left, 1))    # (L, K)
        self.right = jnp.tile(init_vec[None, :], (right, 1))  # (R, K)
        self.padding_idx = padding_idx
        self.row_tile = row_tile          # use 128 on v5e (128-wide MXU)
        self.d_tile = d_tile
        self.token_tile = token_tile
        self.compute_dtype = compute_dtype   # bf16: halves u/M HBM reads, MXU-native
        self.weight_dtype = weight_dtype     # bf16: halves table writeback + gather bytes
        self._weight = None   # eval-mode memoization, like torch's `_todo_svd`

    def reconstruct(self):
        m = fold_projection(self.left, self.s, self.right, self.v)
        return reconstruct_weight(self.u.astype(self.compute_dtype),
                                  m.astype(self.compute_dtype),
                                  row_tile=self.row_tile, d_tile=self.d_tile,
                                  out_dtype=self.weight_dtype)

    def __call__(self, ids):
        if self._weight is None:
            # Forward-only port: parameters are static, so cache the table like
            # the torch module does once it leaves training mode.
            # TODO(synk): invalidate the cache if u/s/v/left/right are updated
            # (training-mode `_todo_svd` re-computation is not modeled here).
            self._weight = self.reconstruct()
        return embedding_gather(self._weight, ids, token_tile=self.token_tile)


# ----------------------------------------------------------------------------
# Pure-JAX f32 reference (mirrors the torch forward exactly)
# ----------------------------------------------------------------------------
def _ref_forward(u, left, s, right, v, ids):
    w = u
    for i in range(left.shape[0]):
        vec = left[i]
        vhat = vec / jnp.maximum(jnp.sqrt(jnp.sum(vec * vec)), EPS)
        w = w - 2.0 * (w @ vhat)[:, None] * vhat[None, :]
    w = w * s[None, :]
    for i in range(right.shape[0]):
        vec = right[i]
        vhat = vec / jnp.maximum(jnp.sqrt(jnp.sum(vec * vec)), EPS)
        w = w - 2.0 * (w @ vhat)[:, None] * vhat[None, :]
    w = w @ v
    return w[ids]


if __name__ == "__main__":
    N, D = 64, 32          # num_embeddings, embedding_dim
    B, S = 2, 8            # batch, sequence length of the index tensor

    key = jax.random.PRNGKey(0)
    k_w, k_ids = jax.random.split(key)
    base_weight = jax.random.normal(k_w, (N, D), dtype=jnp.float32)
    ids = jax.random.randint(k_ids, (B, S), 0, N, dtype=jnp.int32)

    model = ForwardEmbeddingPallas(base_weight, sigma=True, left=2, right=2,
                                   padding_idx=0)
    out = model(ids)
    out = jax.block_until_ready(out)
    assert out.shape == (B, S, D)

    # f32 reference; kernel path runs the matmul in bf16 (f32 accumulation) and
    # caches the table in bf16, so compare at bf16-appropriate tolerance.
    ref = _ref_forward(model.u, model.left, model.s, model.right, model.v, ids)
    np.testing.assert_allclose(np.asarray(out, np.float32), np.asarray(ref),
                               rtol=5e-2, atol=5e-2)
    print("KERNEL_OK")
</pallas_src>

<mosaic_0001>
module attributes {stable_mosaic.version = 11 : i64} {
  func.func @fold_kernel(%arg0: i32, %arg1: memref<32x2xf32, #tpu.memory_space<vmem>>, %arg2: memref<32x1xf32, #tpu.memory_space<vmem>>, %arg3: memref<32x2xf32, #tpu.memory_space<vmem>>, %arg4: memref<32x32xf32, #tpu.memory_space<vmem>>, %arg5: memref<32x32xf32, #tpu.memory_space<vmem>>) attributes {dimension_semantics = [#tpu.dimension_semantics<arbitrary>], iteration_bounds = array<i64: 1>, scalar_prefetch = 0 : i64, scratch_operands = 0 : i64, tpu.core_type = #tpu.core_type<tc>, window_params = [{pipeline_mode = #tpu.pipeline_mode<synchronous>, transform_indices = @transform_0, window_bounds = array<i64: 32, 2>}, {pipeline_mode = #tpu.pipeline_mode<synchronous>, transform_indices = @transform_1, window_bounds = array<i64: 32, 1>}, {pipeline_mode = #tpu.pipeline_mode<synchronous>, transform_indices = @transform_2, window_bounds = array<i64: 32, 2>}, {pipeline_mode = #tpu.pipeline_mode<synchronous>, transform_indices = @transform_3, window_bounds = array<i64: 32, 32>}, {pipeline_mode = #tpu.pipeline_mode<synchronous>, transform_indices = @transform_4, window_bounds = array<i64: 32, 32>}]} {
    %c0 = arith.constant 0 : index
    %c0_0 = arith.constant 0 : index
    %0 = vector.load %arg4[%c0, %c0_0] : memref<32x32xf32, #tpu.memory_space<vmem>>, vector<32x32xf32>
    %c0_1 = arith.constant 0 : index
    %c0_2 = arith.constant 0 : index
    %1 = vector.load %arg3[%c0_1, %c0_2] : memref<32x2xf32, #tpu.memory_space<vmem>>, vector<32x2xf32>
    %c0_3 = arith.constant 0 : index
    %c0_4 = arith.constant 0 : index
    %2 = vector.load %arg1[%c0_3, %c0_4] : memref<32x2xf32, #tpu.memory_space<vmem>>, vector<32x2xf32>
    %3 = vector.extract_strided_slice %1 {offsets = [0, 1], sizes = [32, 1], strides = [1, 1]} : vector<32x2xf32> to vector<32x1xf32>
    %4 = arith.mulf %3, %3 : vector<32x1xf32>
    %5 = vector.shape_cast %4 : vector<32x1xf32> to vector<1x32x1xf32>
    %cst = arith.constant dense<0.000000e+00> : vector<1xf32>
    %6 = vector.multi_reduction <add>, %5, %cst [1, 2] : vector<1x32x1xf32> to vector<1xf32>
    %7 = vector.shape_cast %6 : vector<1xf32> to vector<1x1x1xf32>
    %8 = vector.extract %7[0, 0, 0] : f32 from vector<1x1x1xf32>
    %9 = math.sqrt %8 : f32
    %cst_5 = arith.constant 9.99999996E-13 : f32
    %10 = arith.maximumf %9, %cst_5 : f32
    %11 = vector.broadcast %10 : f32 to vector<32x1xf32>
    %12 = arith.divf %3, %11 : vector<32x1xf32>
    %13 = vector.broadcast %12 : vector<32x1xf32> to vector<32x32xf32>
    %14 = arith.mulf %0, %13 : vector<32x32xf32>
    %cst_6 = arith.constant dense<0.000000e+00> : vector<32xf32>
    %15 = vector.multi_reduction <add>, %14, %cst_6 [0] : vector<32x32xf32> to vector<32xf32>
    %16 = vector.shape_cast %15 : vector<32xf32> to vector<1x32xf32>
    %cst_7 = arith.constant 2.000000e+00 : f32
    %17 = vector.broadcast %cst_7 : f32 to vector<32x1xf32>
    %18 = arith.mulf %17, %12 : vector<32x1xf32>
    %19 = vector.broadcast %18 : vector<32x1xf32> to vector<32x32xf32>
    %20 = vector.broadcast %16 : vector<1x32xf32> to vector<32x32xf32>
    %21 = arith.mulf %19, %20 : vector<32x32xf32>
    %22 = arith.subf %0, %21 : vector<32x32xf32>
    %23 = vector.extract_strided_slice %1 {offsets = [0, 0], sizes = [32, 1], strides = [1, 1]} : vector<32x2xf32> to vector<32x1xf32>
    %24 = arith.mulf %23, %23 : vector<32x1xf32>
    %25 = vector.shape_cast %24 : vector<32x1xf32> to vector<1x32x1xf32>
    %cst_8 = arith.constant dense<0.000000e+00> : vector<1xf32>
    %26 = vector.multi_reduction <add>, %25, %cst_8 [1, 2] : vector<1x32x1xf32> to vector<1xf32>
    %27 = vector.shape_cast %26 : vector<1xf32> to vector<1x1x1xf32>
    %28 = vector.extract %27[0, 0, 0] : f32 from vector<1x1x1xf32>
    %29 = math.sqrt %28 : f32
    %cst_9 = arith.constant 9.99999996E-13 : f32
    %30 = arith.maximumf %29, %cst_9 : f32
    %31 = vector.broadcast %30 : f32 to vector<32x1xf32>
    %32 = arith.divf %23, %31 : vector<32x1xf32>
    %33 = vector.broadcast %32 : vector<32x1xf32> to vector<32x32xf32>
    %34 = arith.mulf %22, %33 : vector<32x32xf32>
    %cst_10 = arith.constant dense<0.000000e+00> : vector<32xf32>
    %35 = vector.multi_reduction <add>, %34, %cst_10 [0] : vector<32x32xf32> to vector<32xf32>
    %36 = vector.shape_cast %35 : vector<32xf32> to vector<1x32xf32>
    %cst_11 = arith.constant 2.000000e+00 : f32
    %37 = vector.broadcast %cst_11 : f32 to vector<32x1xf32>
    %38 = arith.mulf %37, %32 : vector<32x1xf32>
    %39 = vector.broadcast %38 : vector<32x1xf32> to vector<32x32xf32>
    %40 = vector.broadcast %36 : vector<1x32xf32> to vector<32x32xf32>
    %41 = arith.mulf %39, %40 : vector<32x32xf32>
    %42 = arith.subf %22, %41 : vector<32x32xf32>
    %c0_12 = arith.constant 0 : index
    %c0_13 = arith.constant 0 : index
    %43 = vector.load %arg2[%c0_12, %c0_13] : memref<32x1xf32, #tpu.memory_space<vmem>>, vector<32x1xf32>
    %44 = vector.broadcast %43 : vector<32x1xf32> to vector<32x32xf32>
    %45 = arith.mulf %44, %42 : vector<32x32xf32>
    %46 = vector.extract_strided_slice %2 {offsets = [0, 1], sizes = [32, 1], strides = [1, 1]} : vector<32x2xf32> to vector<32x1xf32>
    %47 = arith.mulf %46, %46 : vector<32x1xf32>
    %48 = vector.shape_cast %47 : vector<32x1xf32> to vector<1x32x1xf32>
    %cst_14 = arith.constant dense<0.000000e+00> : vector<1xf32>
    %49 = vector.multi_reduction <add>, %48, %cst_14 [1, 2] : vector<1x32x1xf32> to vector<1xf32>
    %50 = vector.shape_cast %49 : vector<1xf32> to vector<1x1x1xf32>
    %51 = vector.extract %50[0, 0, 0] : f32 from vector<1x1x1xf32>
    %52 = math.sqrt %51 : f32
    %cst_15 = arith.constant 9.99999996E-13 : f32
    %53 = arith.maximumf %52, %cst_15 : f32
    %54 = vector.broadcast %53 : f32 to vector<32x1xf32>
    %55 = arith.divf %46, %54 : vector<32x1xf32>
    %56 = vector.broadcast %55 : vector<32x1xf32> to vector<32x32xf32>
    %57 = arith.mulf %45, %56 : vector<32x32xf32>
    %cst_16 = arith.constant dense<0.000000e+00> : vector<32xf32>
    %58 = vector.multi_reduction <add>, %57, %cst_16 [0] : vector<32x32xf32> to vector<32xf32>
    %59 = vector.shape_cast %58 : vector<32xf32> to vector<1x32xf32>
    %cst_17 = arith.constant 2.000000e+00 : f32
    %60 = vector.broadcast %cst_17 : f32 to vector<32x1xf32>
    %61 = arith.mulf %60, %55 : vector<32x1xf32>
    %62 = vector.broadcast %61 : vector<32x1xf32> to vector<32x32xf32>
    %63 = vector.broadcast %59 : vector<1x32xf32> to vector<32x32xf32>
    %64 = arith.mulf %62, %63 : vector<32x32xf32>
    %65 = arith.subf %45, %64 : vector<32x32xf32>
    %66 = vector.extract_strided_slice %2 {offsets = [0, 0], sizes = [32, 1], strides = [1, 1]} : vector<32x2xf32> to vector<32x1xf32>
    %67 = arith.mulf %66, %66 : vector<32x1xf32>
    %68 = vector.shape_cast %67 : vector<32x1xf32> to vector<1x32x1xf32>
    %cst_18 = arith.constant dense<0.000000e+00> : vector<1xf32>
    %69 = vector.multi_reduction <add>, %68, %cst_18 [1, 2] : vector<1x32x1xf32> to vector<1xf32>
    %70 = vector.shape_cast %69 : vector<1xf32> to vector<1x1x1xf32>
    %71 = vector.extract %70[0, 0, 0] : f32 from vector<1x1x1xf32>
    %72 = math.sqrt %71 : f32
    %cst_19 = arith.constant 9.99999996E-13 : f32
    %73 = arith.maximumf %72, %cst_19 : f32
    %74 = vector.broadcast %73 : f32 to vector<32x1xf32>
    %75 = arith.divf %66, %74 : vector<32x1xf32>
    %76 = vector.broadcast %75 : vector<32x1xf32> to vector<32x32xf32>
    %77 = arith.mulf %65, %76 : vector<32x32xf32>
    %cst_20 = arith.constant dense<0.000000e+00> : vector<32xf32>
    %78 = vector.multi_reduction <add>, %77, %cst_20 [0] : vector<32x32xf32> to vector<32xf32>
    %79 = vector.shape_cast %78 : vector<32xf32> to vector<1x32xf32>
    %cst_21 = arith.constant 2.000000e+00 : f32
    %80 = vector.broadcast %cst_21 : f32 to vector<32x1xf32>
    %81 = arith.mulf %80, %75 : vector<32x1xf32>
    %82 = vector.broadcast %81 : vector<32x1xf32> to vector<32x32xf32>
    %83 = vector.broadcast %79 : vector<1x32xf32> to vector<32x32xf32>
    %84 = arith.mulf %82, %83 : vector<32x32xf32>
    %85 = arith.subf %65, %84 : vector<32x32xf32>
    %c0_22 = arith.constant 0 : index
    %c0_23 = arith.constant 0 : index
    %86 = vector.load %arg5[%c0_22, %c0_23] : memref<32x32xf32, #tpu.memory_space<vmem>>, vector<32x32xf32>
    tpu.vector_store %arg5[%c0_22, %c0_23], %85 {strides = array<i32>} : memref<32x32xf32, #tpu.memory_space<vmem>>, vector<32x32xf32>,
    return
  }
  func.func @transform_0(%arg0: i32) -> (i32, i32) {
    %c0_i32 = arith.constant 0 : i32
    %c0_i32_0 = arith.constant 0 : i32
    %c0_i32_1 = arith.constant 0 : i32
    return %c0_i32, %c0_i32_0 : i32, i32
  }
  func.func @transform_1(%arg0: i32) -> (i32, i32) {
    %c0_i32 = arith.constant 0 : i32
    %c0_i32_0 = arith.constant 0 : i32
    %c0_i32_1 = arith.constant 0 : i32
    return %c0_i32, %c0_i32_0 : i32, i32
  }
  func.func @transform_2(%arg0: i32) -> (i32, i32) {
    %c0_i32 = arith.constant 0 : i32
    %c0_i32_0 = arith.constant 0 : i32
    %c0_i32_1 = arith.constant 0 : i32
    return %c0_i32, %c0_i32_0 : i32, i32
  }
  func.func @transform_3(%arg0: i32) -> (i32, i32) {
    %c0_i32 = arith.constant 0 : i32
    %c0_i32_0 = arith.constant 0 : i32
    %c0_i32_1 = arith.constant 0 : i32
    return %c0_i32, %c0_i32_0 : i32, i32
  }
  func.func @transform_4(%arg0: i32) -> (i32, i32) {
    %c0_i32 = arith.constant 0 : i32
    %c0_i32_0 = arith.constant 0 : i32
    %c0_i32_1 = arith.constant 0 : i32
    return %c0_i32, %c0_i32_0 : i32, i32
  }
}

</mosaic_0001>

<bundles_post_ra>
// kernel: tpu_custom_call.1
= control target key start
LH: loop header
LB: loop body
LE: loop exit
PB: predicated region body
PF: predicated region fallthrough
CT: control target
= control target key end

     0   :  { %s878_s0 = inlined_call_operand.vmem [shape: f32[32,2], index: 0, kind: input, shape index: {}]   ;;  %s879_s1 = inlined_call_operand.vmem [shape: f32[32,1], index: 1, kind: input, shape index: {}]   ;;  %s880_s2 = inlined_call_operand.vmem [shape: f32[32,2], index: 2, kind: input, shape index: {}]   ;;  %s881_s3 = inlined_call_operand.vmem [shape: f32[32,32], index: 3, kind: input, shape index: {}]   ;;  %s882_s4 = inlined_call_operand.hbm [shape: f32[32,32], index: 4, kind: output, shape index: {}]  }
   0x1   :  { %v710_v0 = vld [vmem:[%s880_s2] sm:$0xff]  ;;  %v715_v1 = vld [vmem:[%s880_s2 + $0x10] sm:$0xff] }
   0x2   :  { %v30_v2 = vmul.f32 %v710_v0, %v710_v0  ;;  %v32_v3 = vmul.f32 %v715_v1, %v715_v1 }
   0x3   :  { %9 = vsyncpa [#allocation3], 0  ;;  %s675_s19 = smov 127   ;;  %v726_v4 = vld [vmem:[%s880_s2 + $0x8] sm:$0xff]  ;;  %v731_v5 = vld [vmem:[%s880_s2 + $0x18] sm:$0xff]  ;;  %vm50_vm0 = vcmask 7168  }
   0x4   :  { %38 = vrot.lane.b32.xlu0 %v30_v2, %s675_s19  ;;  %42 = vrot.lane.b32.xlu1 %v32_v3, %s675_s19  ;;  %v31_v6 = vmul.f32 %v726_v4, %v726_v4  ;;  %v33_v7 = vmul.f32 %v731_v5, %v731_v5  ;;  %v171_v8 = vsel %vm50_vm0, %v30_v2, 0.0  ;;  %v174_v10 = vsel %vm50_vm0, %v32_v3, 0.0  ;;  %v745_v13 = vld [vmem:[%s878_s0] sm:$0xff]  ;;  %v750_v14 = vld [vmem:[%s878_s0 + $0x8] sm:$0xff]  ;;  %s677_s6 = smov 1e-12  }
   0x5   :  { %v318_v15 = vmul.f32 %v745_v13, %v745_v13  ;;  %v319_v16 = vmul.f32 %v750_v14, %v750_v14  ;;  %v761_v17 = vld [vmem:[%s878_s0 + $0x18] sm:$0xff]  ;;  %v774_v32 = vld [vmem:[%s878_s0 + $0x10] sm:$0xff]  ;;  %s679_s30 = smov [#allocation2]   ;;  %s681_s9 = smov 8  }
   0x6   :  { %v172_v9 = vsel %vm50_vm0, %v31_v6, 0.0  ;;  %v321_v18 = vmul.f32 %v761_v17, %v761_v17  ;;  %v176_v30 = vsel %vm50_vm0, %v33_v7, 0.0  ;;  %v320_v33 = vmul.f32 %v774_v32, %v774_v32 }
   0x7   :  { %v173_v11 = vadd.f32 %v172_v9, %v171_v8  ;;  %v457_v53 = vsel %vm50_vm0, %v318_v15, 0.0  ;;  %v458_v54 = vsel %vm50_vm0, %v319_v16, 0.0 }
   0x8   :  { %v459_v55 = vadd.f32 %v458_v54, %v457_v53  ;;  %v460_v56 = vsel %vm50_vm0, %v320_v33, 0.0  ;;  %v462_v57 = vsel %vm50_vm0, %v321_v18, 0.0 }
   0x9   :  { %v175_v12 = vadd.f32 %v174_v10, %v173_v11 }
   0xa   :  { %v461_v58 = vadd.f32 %v460_v56, %v459_v55 }
   0xb   :  { %v177_v31 = vadd.f32 %v176_v30, %v175_v12 }
   0xc   :  { %40 = vrot.lane.b32.xlu0 %v31_v6, %s675_s19  ;;  %44 = vrot.lane.b32.xlu1 %v33_v7, %s675_s19  ;;  %v463_v59 = vadd.f32 %v462_v57, %v461_v58  ;;  %v292_v58 = vld [vmem:[%s879_s1 + $0x10] sm:$0xff] }
  0x14   :  { %326 = vrot.lane.b32.xlu0 %v318_v15, %s675_s19  ;;  %328 = vrot.lane.b32.xlu1 %v319_v16, %s675_s19 }
  0x1c   :  { %332 = vrot.lane.b32.xlu0 %v321_v18, %s675_s19 }
  0x76   :  { %v39_v19 = vpop.permute.xlu0 %38  ;;  %v43_v20 = vpop.permute.xlu1 %42 }
  0x77   :  { %v51_v23 = vsel %vm50_vm0, %v39_v19, 0.0  ;;  %v54_v26 = vsel %vm50_vm0, %v43_v20, 0.0  ;;  %v676_v20 = vmov 1  }
  0x78   :  { %621 = vset.pattern.permute.xlu0 %v676_v20  ;;  %623 = vset.pattern.permute.xlu2 %v676_v20 }
  0x79   :  { %622 = vset.pattern.permute.xlu1 %v676_v20 }
  0x7e   :  { %v41_v21 = vpop.permute.xlu0 %40  ;;  %v45_v22 = vpop.permute.xlu1 %44 }
  0x7f   :  { %v52_v24 = vsel %vm50_vm0, %v41_v21, 0.0  ;;  %v56_v27 = vsel %vm50_vm0, %v45_v22, 0.0 }
  0x80   :  { %v53_v25 = vadd.f32 %v52_v24, %v51_v23 }
  0x82   :  { %v55_v28 = vadd.f32 %v54_v26, %v53_v25 }
  0x84   :  { %v57_v29 = vadd.f32 %v56_v27, %v55_v28 }
  0x86   :  { %58 = vadd.xlane.f32.xlu2 %v57_v29  ;;  %v327_v37 = vpop.permute.xlu0 %326  ;;  %v329_v41 = vpop.permute.xlu1 %328 }
  0x87   :  { %v338_v43 = vsel %vm50_vm0, %v327_v37, 0.0  ;;  %v339_v45 = vsel %vm50_vm0, %v329_v41, 0.0 }
  0x88   :  { %v340_v46 = vadd.f32 %v339_v45, %v338_v43 }
  0x8e   :  { %178 = vadd.xlane.f32.xlu2 %v177_v31  ;;  %v333_v47 = vpop.permute.xlu0 %332 }
  0x8f   :  { %v343_v50 = vsel %vm50_vm0, %v333_v47, 0.0 }
  0xa6   :  { %330 = vrot.lane.b32.xlu2 %v320_v33, %s675_s19 }
  0xcf   :  { %464 = vadd.xlane.f32.xlu2 %v463_v59  ;;  %v678_v59 = vmov 0  }
  0xf9   :  { %v59_v34 = vpop.xlane.xlu2 %58 }
  0xfa   :  { %v60_v35 = vrot.slane %v59_v34, 4 }
  0xfc   :  { %v61_v36 = vadd.f32 %v60_v35, %v59_v34 }
  0xfe   :  { %v62_v38 = vrot.slane %v61_v36, 2 }
 0x100   :  { %v63_v39 = vadd.f32 %v62_v38, %v61_v36 }
 0x101   :  { %v179_v40 = vpop.xlane.xlu2 %178 }
 0x102   :  { %v64_v42 = vrot.slane %v63_v39, 1  ;;  %v180_v61 = vrot.slane %v179_v40, 4 }
 0x104   :  { %v65_v44 = vadd.f32 %v64_v42, %v63_v39  ;;  %v181_v62 = vadd.f32 %v180_v61, %v179_v40 }
 0x106   :  { %598 = vpush %v65_v44  ;;  %v182_v3 = vrot.slane %v181_v62, 2 }
 0x108   :  { %v183_v8 = vadd.f32 %v182_v3, %v181_v62 }
 0x109   :  { %v331_v48 = vpop.permute.xlu2 %330 }
 0x10a   :  { %v341_v49 = vsel %vm50_vm0, %v331_v48, 0.0  ;;  %v184_v11 = vrot.slane %v183_v8, 1 }
 0x10b   :  { %v342_v51 = vadd.f32 %v341_v49, %v340_v46 }
 0x10c   :  { %v185_v19 = vadd.f32 %v184_v11, %v183_v8 }
 0x10d   :  { %v344_v52 = vadd.f32 %v343_v50, %v342_v51 }
 0x10f   :  { %345 = vadd.xlane.f32.xlu1 %v344_v52 }
 0x137   :  { %s599_s0 = spop %598 }
 0x138   :  { %v67_v60 = vstv %s599_s0  ;;  %s584_s0 = sshll.u32 %s679_s30, 4  ;;  %s585_s0 = int_to_ptr.vmem [resolvable:$true] %s584_s0 }
 0x139   :  { %633 = vrsqrt.f32 %v67_v60  ;;  %vm75_vm1 = vcmp.eq.f32.partialorder %v67_v60, inf  ;;  %v78_v15 = vand.u32 2147483648, %v67_v60  ;;  %vm77_vm2 = vcmp.eq.f32.partialorder %v67_v60, 0.0 }
 0x13f   :  { %v634_v63 = vpop.eup %633 }
 0x140   :  { %v69_v2 = vmul.f32 %v634_v63, %v67_v60 }
 0x142   :  { %v70_v6 = vmul.f32 %v634_v63, %v69_v2  ;;  %v465_v61 = vpop.xlane.xlu2 %464 }
 0x143   :  { %v466_v2 = vrot.slane %v465_v61, 4 }
 0x144   :  { %v71_v7 = vmul.f32 0.5, %v70_v6 }
 0x145   :  { %v467_v3 = vadd.f32 %v466_v2, %v465_v61 }
 0x146   :  { %v72_v9 = vsub.f32 1.5, %v71_v7 }
 0x147   :  { %v468_v11 = vrot.slane %v467_v3, 2 }
 0x148   :  { %v73_v10 = vmul.f32 %v634_v63, %v72_v9 }
 0x14a   :  { %v74_v12 = vmul.f32 %v73_v10, %v67_v60 }
 0x14c   :  { %v76_v16 = vsel %vm75_vm1, %v67_v60, %v74_v12 }
 0x14d   :  { %v79_v18 = vsel %vm77_vm2, %v78_v15, %v76_v16 }
 0x14e   :  { %600 = vpush %v79_v18 }
 0x14f   :  { %602 = vpush %v185_v19 }
 0x17f   :  { %s601_s5 = spop %600 }
 0x180   :  { %s81_s7 = smax.f32 %s677_s6, %s601_s5  ;;  %s603_s8 = spop %602 }
 0x181   :  { %v82_v21 = vstv %s81_s7  ;;  %v187_v22 = vstv %s603_s8  ;;  %s586_s7 = sshll.u32 %s882_s4, 4  ;;  %s680_s8 = smov 128   ;;  %s587_s7 = int_to_ptr.hbm [resolvable:$true] %s586_s7 }
 0x182   :  { %635 = vrcp.f32 %v82_v21  ;;  %v346_v23 = vpop.xlane.xlu1 %345  ;;  %v94_v33 = vand.u32 2147483648, %v82_v21  ;;  %v92_v36 = vand.u32 2147483647, %v82_v21  ;;  %vm88_vm4 = vweird.f32 %v82_v21 }
 0x183   :  { %637 = vrsqrt.f32 %v187_v22  ;;  %v347_v24 = vrot.slane %v346_v23, 4  ;;  %vm195_vm7 = vcmp.eq.f32.partialorder %v187_v22, inf  ;;  %v198_v49 = vand.u32 2147483648, %v187_v22 }
 0x184   :  { %v95_v40 = vor.u32 1.1754944e-38, %v94_v33  ;;  %vm93_vm6 = vcmp.eq.f32.partialorder %v92_v36, 8.507059e+37  ;;  %vm197_vm8 = vcmp.eq.f32.partialorder %v187_v22, 0.0 }
 0x185   :  { %v348_v25 = vadd.f32 %v347_v24, %v346_v23 }
 0x187   :  { %v349_v31 = vrot.slane %v348_v25, 2 }
 0x188   :  { %v636_v26 = vpop.eup %635 }
 0x189   :  { %v638_v27 = vpop.eup %637  ;;  %v84_v28 = vmul.f32 %v636_v26, %v82_v21  ;;  %vm89_vm3 = vweird.f32 %v636_v26  ;;  %v350_v39 = vadd.f32 %v349_v31, %v348_v25 }
 0x18a   :  { %v189_v29 = vmul.f32 %v638_v27, %v187_v22  ;;  %vm90_vm5 = vmor %vm88_vm4, %vm89_vm3 }
 0x18b   :  { %v85_v30 = vsub.f32 1.0, %v84_v28  ;;  %v351_v46 = vrot.slane %v350_v39, 1 }
 0x18c   :  { %v190_v34 = vmul.f32 %v638_v27, %v189_v29 }
 0x18d   :  { %v86_v35 = vmul.f32 %v636_v26, %v85_v30  ;;  %v352_v54 = vadd.f32 %v351_v46, %v350_v39 }
 0x18e   :  { %v191_v37 = vmul.f32 0.5, %v190_v34 }
 0x18f   :  { %v87_v38 = vadd.f32 %v636_v26, %v86_v35 }
 0x190   :  { %v192_v41 = vsub.f32 1.5, %v191_v37 }
 0x191   :  { %v91_v42 = vsel %vm90_vm5, %v636_v26, %v87_v38  ;;  %vm125_vm5 = vcmask 261120  }
 0x192   :  { %v96_v43 = vsel %vm93_vm6, %v95_v40, %v91_v42  ;;  %v193_v44 = vmul.f32 %v638_v27, %v192_v41  ;;  %v290_v40 = vld [vmem:[%s879_s1] sm:$0xff] }
 0x193   :  { %v97_v45 = vmul.f32 %v96_v43, %v710_v0  ;;  %v100_v47 = vmul.f32 %v96_v43, %v731_v5  ;;  %v98_v55 = vmul.f32 %v96_v43, %v726_v4  ;;  %v99_v56 = vmul.f32 %v96_v43, %v715_v1 }
 0x194   :  { %v194_v48 = vmul.f32 %v193_v44, %v187_v22 }
 0x195   :  { %103 = vperm.xlu0 %621, %v97_v45   ;;  %v142_v50 = vmul.f32 2.0, %v100_v47  ;;  %v139_v51 = vmul.f32 2.0, %v97_v45  ;;  %v140_v57 = vmul.f32 2.0, %v98_v55  ;;  %v141_v60 = vmul.f32 2.0, %v99_v56 }
 0x196   :  { %v196_v52 = vsel %vm195_vm7, %v187_v22, %v194_v48  ;;  %v469_v22 = vadd.f32 %v468_v11, %v467_v3 }
 0x197   :  { %v199_v53 = vsel %vm197_vm8, %v198_v49, %v196_v52  ;;  %160 = vperm.xlu2 %623, %v142_v50   ;;  %145 = vperm.xlu1 %622, %v139_v51  }
 0x198   :  { %604 = vpush %v199_v53  ;;  %v470_v30 = vrot.slane %v469_v22, 1 }
 0x199   :  { %606 = vpush %v352_v54 }
 0x19a   :  { %v471_v37 = vadd.f32 %v470_v30, %v469_v22  ;;  %v837_v22 = vld [vmem:[%s881_s3 + $0x10] sm:$0xff] }
 0x19d   :  { %108 = vperm.xlu0 %621, %v98_v55  }
 0x19f   :  { %626 = vset.pattern.permute.xlu2 %v678_v59  ;;  %625 = vset.pattern.permute.xlu1 %v678_v59 }
 0x1a0   :  { %306 = vperm.xlu2 %626, %v292_v58  }
 0x1a5   :  { %113 = vperm.xlu0 %621, %v99_v56  }
 0x1ad   :  { %118 = vperm.xlu0 %621, %v100_v47  }
 0x1b5   :  { %150 = vperm.xlu0 %621, %v140_v57  }
 0x1bd   :  { %155 = vperm.xlu0 %621, %v141_v60  }
 0x1c5   :  { %624 = vset.pattern.permute.xlu0 %v678_v59 }
 0x1c9   :  { %s605_s11 = spop %604 }
 0x1ca   :  { %s201_s12 = smax.f32 %s677_s6, %s605_s11  ;;  %s607_s13 = spop %606 }
 0x1cb   :  { %v202_v62 = vstv %s201_s12  ;;  %v354_v63 = vstv %s607_s13 }
 0x1cc   :  { %639 = vrcp.f32 %v202_v62  ;;  %v214_v12 = vand.u32 2147483648, %v202_v62  ;;  %v212_v18 = vand.u32 2147483647, %v202_v62  ;;  %vm208_vm10 = vweird.f32 %v202_v62 }
 0x1cd   :  { %641 = vrsqrt.f32 %v354_v63  ;;  %vm362_vm13 = vcmp.eq.f32.partialorder %v354_v63, inf  ;;  %v365_v33 = vand.u32 2147483648, %v354_v63  ;;  %vm364_vm14 = vcmp.eq.f32.partialorder %v354_v63, 0.0 }
 0x1ce   :  { %v215_v23 = vor.u32 1.1754944e-38, %v214_v12  ;;  %vm213_vm12 = vcmp.eq.f32.partialorder %v212_v18, 8.507059e+37  ;;  %v829_v18 = vld [vmem:[%s881_s3 + $0x8] sm:$0xff] }
 0x1d2   :  { %v640_v6 = vpop.eup %639 }
 0x1d3   :  { %v642_v7 = vpop.eup %641  ;;  %v204_v8 = vmul.f32 %v640_v6, %v202_v62  ;;  %vm209_vm9 = vweird.f32 %v640_v6 }
 0x1d4   :  { %v356_v9 = vmul.f32 %v642_v7, %v354_v63  ;;  %vm210_vm11 = vmor %vm208_vm10, %vm209_vm9 }
 0x1d5   :  { %v205_v10 = vsub.f32 1.0, %v204_v8 }
 0x1d6   :  { %v357_v15 = vmul.f32 %v642_v7, %v356_v9 }
 0x1d7   :  { %v206_v16 = vmul.f32 %v640_v6, %v205_v10 }
 0x1d8   :  { %v358_v19 = vmul.f32 0.5, %v357_v15 }
 0x1d9   :  { %v207_v21 = vadd.f32 %v640_v6, %v206_v16 }
 0x1da   :  { %v359_v24 = vsub.f32 1.5, %v358_v19 }
 0x1db   :  { %v211_v25 = vsel %vm210_vm11, %v640_v6, %v207_v21  ;;  %v18_v21 = vld [vmem:[%s881_s3] sm:$0xff] }
 0x1dc   :  { %v216_v26 = vsel %vm213_vm12, %v215_v23, %v211_v25  ;;  %v360_v27 = vmul.f32 %v642_v7, %v359_v24 }
 0x1dd   :  { %v217_v28 = vmul.f32 %v216_v26, %v710_v0  ;;  %v218_v29 = vmul.f32 %v216_v26, %v726_v4  ;;  %v220_v38 = vmul.f32 %v216_v26, %v731_v5  ;;  %v291_v0 = vld [vmem:[%s879_s1 + $0x8] sm:$0xff]  ;;  %v219_v4 = vmul.f32 %v216_v26, %v715_v1  ;;  %v293_v5 = vld [vmem:[%s879_s1 + $0x18] sm:$0xff] }
 0x1de   :  { %v361_v31 = vmul.f32 %v360_v27, %v354_v63 }
 0x1df   :  { %223 = vperm.xlu0 %624, %v217_v28   ;;  %228 = vperm.xlu1 %625, %v218_v29   ;;  %v258_v34 = vmul.f32 2.0, %v217_v28  ;;  %v261_v39 = vmul.f32 2.0, %v220_v38  ;;  %v260_v41 = vmul.f32 2.0, %v219_v4  ;;  %v259_v1 = vmul.f32 2.0, %v218_v29 }
 0x1e0   :  { %v363_v35 = vsel %vm362_vm13, %v354_v63, %v361_v31 }
 0x1e1   :  { %v366_v36 = vsel %vm364_vm14, %v365_v33, %v363_v35  ;;  %264 = vperm.xlu2 %626, %v258_v34  }
 0x1e2   :  { %608 = vpush %v366_v36 }
 0x1e3   :  { %610 = vpush %v471_v37 }
 0x1e7   :  { %301 = vperm.xlu0 %624, %v291_v0   ;;  %233 = vperm.xlu1 %625, %v219_v4  }
 0x1e9   :  { %279 = vperm.xlu2 %626, %v261_v39  }
 0x1ef   :  { %238 = vperm.xlu0 %624, %v220_v38   ;;  %296 = vperm.xlu1 %625, %v290_v40  }
 0x1f1   :  { %628 = vset.pattern.permute.xlu2 %v676_v20 }
 0x1f7   :  { %274 = vperm.xlu0 %624, %v260_v41   ;;  %311 = vperm.xlu1 %625, %v293_v5  }
 0x1ff   :  { %269 = vperm.xlu1 %625, %v259_v1   ;;  %627 = vset.pattern.permute.xlu0 %v676_v20 }
 0x207   :  { %629 = vset.pattern.permute.xlu1 %v676_v20  ;;  %v104_v10 = vpop.permute.xlu0 %103 }
 0x208   :  { %v121_v24 = vmul.f32 %v104_v10, %v18_v21 }
 0x20a   :  { %v126_v28 = vsel %vm125_vm5, %v121_v24, 0.0 }
 0x20f   :  { %v109_v15 = vpop.permute.xlu0 %108 }
 0x210   :  { %v122_v23 = vmul.f32 %v109_v15, %v829_v18 }
 0x212   :  { %v127_v26 = vsel %vm125_vm5, %v122_v23, 0.0 }
 0x213   :  { %s609_s20 = spop %608  ;;  %v128_v30 = vadd.f32 %v127_v26, %v126_v28 }
 0x214   :  { %s368_s21 = smax.f32 %s677_s6, %s609_s20  ;;  %s611_s22 = spop %610 }
 0x215   :  { %v369_v42 = vstv %s368_s21  ;;  %v473_v43 = vstv %s611_s22 }
 0x216   :  { %643 = vrcp.f32 %v369_v42  ;;  %v381_v49 = vand.u32 2147483648, %v369_v42  ;;  %v379_v52 = vand.u32 2147483647, %v369_v42  ;;  %vm375_vm0 = vweird.f32 %v369_v42 }
 0x217   :  { %645 = vrsqrt.f32 %v473_v43  ;;  %vm481_vm3 = vcmp.eq.f32.partialorder %v473_v43, inf  ;;  %v484_v2 = vand.u32 2147483648, %v473_v43  ;;  %vm483_vm4 = vcmp.eq.f32.partialorder %v473_v43, 0.0  ;;  %v114_v16 = vpop.permute.xlu0 %113 }
 0x218   :  { %v382_v54 = vor.u32 1.1754944e-38, %v381_v49  ;;  %vm380_vm2 = vcmp.eq.f32.partialorder %v379_v52, 8.507059e+37  ;;  %v123_v25 = vmul.f32 %v114_v16, %v837_v22 }
 0x21a   :  { %v129_v29 = vsel %vm125_vm5, %v123_v25, 0.0 }
 0x21b   :  { %v130_v34 = vadd.f32 %v129_v29, %v128_v30 }
 0x21c   :  { %v644_v44 = vpop.eup %643 }
 0x21d   :  { %v646_v45 = vpop.eup %645  ;;  %v371_v46 = vmul.f32 %v644_v44, %v369_v42  ;;  %vm376_vm15 = vweird.f32 %v644_v44 }
 0x21e   :  { %v475_v47 = vmul.f32 %v646_v45, %v473_v43  ;;  %vm377_vm1 = vmor %vm375_vm0, %vm376_vm15 }
 0x21f   :  { %v372_v48 = vsub.f32 1.0, %v371_v46  ;;  %v119_v19 = vpop.permute.xlu0 %118  ;;  %v146_v46 = vpop.permute.xlu1 %145 }
 0x220   :  { %v476_v50 = vmul.f32 %v646_v45, %v475_v47 }
 0x221   :  { %v373_v51 = vmul.f32 %v644_v44, %v372_v48 }
 0x222   :  { %v477_v53 = vmul.f32 0.5, %v476_v50 }
 0x223   :  { %v374_v20 = vadd.f32 %v644_v44, %v373_v51 }
 0x224   :  { %v478_v55 = vsub.f32 1.5, %v477_v53 }
 0x225   :  { %v378_v56 = vsel %vm377_vm1, %v644_v44, %v374_v20 }
 0x226   :  { %v383_v57 = vsel %vm380_vm2, %v382_v54, %v378_v56  ;;  %v479_v58 = vmul.f32 %v646_v45, %v478_v55 }
 0x227   :  { %v386_v60 = vmul.f32 %v383_v57, %v774_v32  ;;  %v385_v61 = vmul.f32 %v383_v57, %v750_v14  ;;  %v384_v62 = vmul.f32 %v383_v57, %v745_v13  ;;  %v387_v7 = vmul.f32 %v383_v57, %v761_v17  ;;  %v151_v33 = vpop.permute.xlu0 %150 }
 0x228   :  { %v480_v63 = vmul.f32 %v479_v58, %v473_v43 }
 0x229   :  { %400 = vperm.xlu1 %629, %v386_v60   ;;  %395 = vperm.xlu2 %628, %v385_v61   ;;  %v425_v8 = vmul.f32 2.0, %v384_v62  ;;  %v426_v9 = vmul.f32 2.0, %v385_v61  ;;  %v427_v11 = vmul.f32 2.0, %v386_v60  ;;  %v428_v12 = vmul.f32 2.0, %v387_v7  ;;  %v161_v61 = vpop.permute.xlu2 %160 }
 0x22a   :  { %390 = vperm.xlu0 %627, %v384_v62   ;;  %v482_v3 = vsel %vm481_vm3, %v473_v43, %v480_v63 }
 0x22b   :  { %v485_v6 = vsel %vm483_vm4, %v484_v2, %v482_v3 }
 0x22c   :  { %612 = vpush %v485_v6 }
 0x22f   :  { %v156_v4 = vpop.permute.xlu0 %155 }
 0x231   :  { %405 = vperm.xlu2 %628, %v387_v7   ;;  %431 = vperm.xlu1 %629, %v425_v8  }
 0x232   :  { %436 = vperm.xlu0 %627, %v426_v9  }
 0x239   :  { %441 = vperm.xlu2 %628, %v427_v11   ;;  %446 = vperm.xlu1 %629, %v428_v12  }
 0x23a   :  { %630 = vset.pattern.permute.xlu0 %v678_v59 }
 0x241   :  { %631 = vset.pattern.permute.xlu2 %v678_v59  ;;  %632 = vset.pattern.permute.xlu1 %v678_v59  ;;  %v843_v59 = vld [vmem:[%s881_s3 + $0x18] sm:$0xff] }
 0x242   :  { %v124_v27 = vmul.f32 %v119_v19, %v843_v59 }
 0x244   :  { %v131_v31 = vsel %vm125_vm5, %v124_v27, 0.0 }
 0x245   :  { %v132_v36 = vadd.f32 %v131_v31, %v130_v34 }
 0x247   :  { %v133_v37 = vrot.slane %v132_v36, 4 }
 0x249   :  { %v134_v39 = vadd.f32 %v133_v37, %v132_v36 }
 0x24b   :  { %v135_v42 = vrot.slane %v134_v39, 2 }
 0x24d   :  { %v136_v49 = vadd.f32 %v135_v42, %v134_v39 }
 0x24f   :  { %v137_v53 = vrot.slane %v136_v49, 1 }
 0x251   :  { %v224_v47 = vpop.permute.xlu0 %223  ;;  %v229_v20 = vpop.permute.xlu1 %228  ;;  %v138_v54 = vadd.f32 %v137_v53, %v136_v49 }
 0x253   :  { %v164_v60 = vmul.f32 %v151_v33, %v138_v54  ;;  %v166_v62 = vmul.f32 %v161_v61, %v138_v54 }
 0x255   :  { %v168_v63 = vsub.f32 %v829_v18, %v164_v60  ;;  %v170_v11 = vsub.f32 %v843_v59, %v166_v62 }
 0x257   :  { %v242_v8 = vmul.f32 %v229_v20, %v168_v63 }
 0x259   :  { %v302_v57 = vpop.permute.xlu0 %301  ;;  %v234_v6 = vpop.permute.xlu1 %233  ;;  %v246_v15 = vsel %vm125_vm5, %v242_v8, 0.0 }
 0x25d   :  { %s613_s29 = spop %612 }
 0x25e   :  { %s487_s3 = smax.f32 %s677_s6, %s613_s29 }
 0x25f   :  { %v488_v35 = vstv %s487_s3 }
 0x260   :  { %647 = vrcp.f32 %v488_v35  ;;  %v500_v5 = vand.u32 2147483648, %v488_v35  ;;  %v498_v1 = vand.u32 2147483647, %v488_v35  ;;  %vm494_vm7 = vweird.f32 %v488_v35 }
 0x261   :  { %v239_v9 = vpop.permute.xlu0 %238  ;;  %v297_v26 = vpop.permute.xlu1 %296 }
 0x262   :  { %v501_v44 = vor.u32 1.1754944e-38, %v500_v5  ;;  %vm499_vm9 = vcmp.eq.f32.partialorder %v498_v1, 8.507059e+37  ;;  %v244_v16 = vmul.f32 %v239_v9, %v170_v11 }
 0x266   :  { %v648_v38 = vpop.eup %647 }
 0x267   :  { %v490_v0 = vmul.f32 %v648_v38, %v488_v35  ;;  %vm495_vm6 = vweird.f32 %v648_v38 }
 0x268   :  { %vm496_vm8 = vmor %vm494_vm7, %vm495_vm6 }
 0x269   :  { %v491_v40 = vsub.f32 1.0, %v490_v0  ;;  %v312_v59 = vpop.permute.xlu1 %311  ;;  %v275_v35 = vpop.permute.xlu0 %274 }
 0x26b   :  { %v492_v41 = vmul.f32 %v648_v38, %v491_v40 }
 0x26d   :  { %v493_v43 = vadd.f32 %v648_v38, %v492_v41 }
 0x26f   :  { %v497_v45 = vsel %vm496_vm8, %v648_v38, %v493_v43 }
 0x270   :  { %v502_v48 = vsel %vm499_vm9, %v501_v44, %v497_v45 }
 0x271   :  { %v505_v50 = vmul.f32 %v502_v48, %v774_v32  ;;  %v504_v51 = vmul.f32 %v502_v48, %v750_v14  ;;  %v503_v52 = vmul.f32 %v502_v48, %v745_v13  ;;  %v506_v55 = vmul.f32 %v502_v48, %v761_v17  ;;  %v270_v36 = vpop.permute.xlu1 %269 }
 0x272   :  { %v163_v32 = vmul.f32 %v146_v46, %v138_v54  ;;  %v165_v14 = vmul.f32 %v156_v4, %v138_v54 }
 0x273   :  { %519 = vperm.xlu1 %632, %v505_v50   ;;  %514 = vperm.xlu2 %631, %v504_v51   ;;  %v544_v56 = vmul.f32 2.0, %v503_v52  ;;  %v545_v58 = vmul.f32 2.0, %v504_v51  ;;  %v546_v2 = vmul.f32 2.0, %v505_v50  ;;  %v547_v3 = vmul.f32 2.0, %v506_v55 }
 0x274   :  { %509 = vperm.xlu0 %630, %v503_v52   ;;  %v167_v13 = vsub.f32 %v18_v21, %v163_v32  ;;  %v169_v17 = vsub.f32 %v837_v22, %v165_v14  ;;  %v250_v21 = vsel %vm125_vm5, %v244_v16, 0.0  ;;  %v307_v22 = vpop.permute.xlu2 %306 }
 0x276   :  { %v241_v7 = vmul.f32 %v224_v47, %v167_v13  ;;  %v243_v10 = vmul.f32 %v234_v6, %v169_v17 }
 0x278   :  { %v245_v12 = vsel %vm125_vm5, %v241_v7, 0.0  ;;  %v248_v18 = vsel %vm125_vm5, %v243_v10, 0.0 }
 0x279   :  { %v247_v19 = vadd.f32 %v246_v15, %v245_v12 }
 0x27b   :  { %524 = vperm.xlu2 %631, %v506_v55   ;;  %550 = vperm.xlu1 %632, %v544_v56   ;;  %v249_v23 = vadd.f32 %v248_v18, %v247_v19 }
 0x27c   :  { %555 = vperm.xlu0 %630, %v545_v58   ;;  %v265_v29 = vpop.permute.xlu2 %264 }
 0x27d   :  { %v251_v24 = vadd.f32 %v250_v21, %v249_v23 }
 0x27f   :  { %v252_v25 = vrot.slane %v251_v24, 4 }
 0x281   :  { %v253_v27 = vadd.f32 %v252_v25, %v251_v24 }
 0x283   :  { %560 = vperm.xlu2 %631, %v546_v2   ;;  %565 = vperm.xlu1 %632, %v547_v3   ;;  %v254_v28 = vrot.slane %v253_v27, 2 }
 0x284   :  { %v280_v34 = vpop.permute.xlu2 %279 }
 0x285   :  { %v255_v30 = vadd.f32 %v254_v28, %v253_v27 }
 0x287   :  { %v256_v31 = vrot.slane %v255_v30, 1 }
 0x289   :  { %v257_v33 = vadd.f32 %v256_v31, %v255_v30 }
 0x28b   :  { %v282_v37 = vmul.f32 %v265_v29, %v257_v33  ;;  %v283_v38 = vmul.f32 %v270_v36, %v257_v33  ;;  %v284_v4 = vmul.f32 %v275_v35, %v257_v33  ;;  %v285_v42 = vmul.f32 %v280_v34, %v257_v33 }
 0x28c   :  { %v396_v40 = vpop.permute.xlu2 %395 }
 0x28d   :  { %v286_v0 = vsub.f32 %v167_v13, %v282_v37  ;;  %v287_v39 = vsub.f32 %v168_v63, %v283_v38  ;;  %v288_v1 = vsub.f32 %v169_v17, %v284_v4  ;;  %v289_v47 = vsub.f32 %v170_v11, %v285_v42 }
 0x28f   :  { %v314_v41 = vmul.f32 %v297_v26, %v286_v0  ;;  %v315_v43 = vmul.f32 %v302_v57, %v287_v39  ;;  %v316_v49 = vmul.f32 %v307_v22, %v288_v1  ;;  %v317_v20 = vmul.f32 %v312_v59, %v289_v47 }
 0x291   :  { %v409_v45 = vmul.f32 %v396_v40, %v315_v43 }
 0x293   :  { %v413_v50 = vsel %vm125_vm5, %v409_v45, 0.0 }
 0x294   :  { %v406_v52 = vpop.permute.xlu2 %405 }
 0x295   :  { %v411_v54 = vmul.f32 %v406_v52, %v317_v20 }
 0x297   :  { %v417_v58 = vsel %vm125_vm5, %v411_v54, 0.0 }
 0x29b   :  { %v401_v46 = vpop.permute.xlu1 %400 }
 0x29c   :  { %v391_v5 = vpop.permute.xlu0 %390  ;;  %v410_v51 = vmul.f32 %v401_v46, %v316_v49  ;;  %v442_v13 = vpop.permute.xlu2 %441 }
 0x29d   :  { %v408_v44 = vmul.f32 %v391_v5, %v314_v41 }
 0x29e   :  { %v415_v55 = vsel %vm125_vm5, %v410_v51, 0.0 }
 0x29f   :  { %v412_v48 = vsel %vm125_vm5, %v408_v44, 0.0 }
 0x2a0   :  { %v414_v53 = vadd.f32 %v413_v50, %v412_v48 }
 0x2a2   :  { %v416_v56 = vadd.f32 %v415_v55, %v414_v53 }
 0x2a3   :  { %v432_v62 = vpop.permute.xlu1 %431 }
 0x2a4   :  { %v418_v57 = vadd.f32 %v417_v58, %v416_v56  ;;  %v437_v7 = vpop.permute.xlu0 %436 }
 0x2a6   :  { %v419_v60 = vrot.slane %v418_v57, 4 }
 0x2a8   :  { %v420_v32 = vadd.f32 %v419_v60, %v418_v57 }
 0x2aa   :  { %v421_v61 = vrot.slane %v420_v32, 2 }
 0x2ab   :  { %v447_v6 = vpop.permute.xlu1 %446 }
 0x2ac   :  { %v422_v14 = vadd.f32 %v421_v61, %v420_v32 }
 0x2ae   :  { %v423_v63 = vrot.slane %v422_v14, 1 }
 0x2b0   :  { %v424_v2 = vadd.f32 %v423_v63, %v422_v14 }
 0x2b2   :  { %v450_v8 = vmul.f32 %v437_v7, %v424_v2  ;;  %v449_v17 = vmul.f32 %v432_v62, %v424_v2  ;;  %v451_v9 = vmul.f32 %v442_v13, %v424_v2  ;;  %v452_v10 = vmul.f32 %v447_v6, %v424_v2 }
 0x2b4   :  { %v454_v11 = vsub.f32 %v315_v43, %v450_v8  ;;  %v455_v16 = vsub.f32 %v316_v49, %v451_v9  ;;  %v453_v18 = vsub.f32 %v314_v41, %v449_v17  ;;  %v456_v23 = vsub.f32 %v317_v20, %v452_v10 }
 0x2cd   :  { %v515_v3 = vpop.permute.xlu2 %514 }
 0x2ce   :  { %v528_v12 = vmul.f32 %v515_v3, %v454_v11 }
 0x2d0   :  { %v532_v22 = vsel %vm125_vm5, %v528_v12, 0.0 }
 0x2d5   :  { %v525_v19 = vpop.permute.xlu2 %524 }
 0x2d6   :  { %v530_v26 = vmul.f32 %v525_v19, %v456_v23 }
 0x2d8   :  { %v536_v59 = vsel %vm125_vm5, %v530_v26, 0.0 }
 0x2dd   :  { %v561_v0 = vpop.permute.xlu2 %560 }
 0x2e5   :  { %v520_v15 = vpop.permute.xlu1 %519 }
 0x2e6   :  { %v510_v21 = vpop.permute.xlu0 %509  ;;  %v529_v24 = vmul.f32 %v520_v15, %v455_v16 }
 0x2e7   :  { %v527_v25 = vmul.f32 %v510_v21, %v453_v18 }
 0x2e8   :  { %v534_v29 = vsel %vm125_vm5, %v529_v24, 0.0 }
 0x2e9   :  { %v531_v27 = vsel %vm125_vm5, %v527_v25, 0.0 }
 0x2ea   :  { %v533_v28 = vadd.f32 %v532_v22, %v531_v27 }
 0x2ec   :  { %v535_v30 = vadd.f32 %v534_v29, %v533_v28 }
 0x2ed   :  { %v551_v34 = vpop.permute.xlu1 %550 }
 0x2ee   :  { %v537_v31 = vadd.f32 %v536_v59, %v535_v30  ;;  %v556_v39 = vpop.permute.xlu0 %555 }
 0x2f0   :  { %v538_v33 = vrot.slane %v537_v31, 4 }
 0x2f2   :  { %v539_v35 = vadd.f32 %v538_v33, %v537_v31 }
 0x2f4   :  { %v540_v36 = vrot.slane %v539_v35, 2 }
 0x2f5   :  { %v566_v40 = vpop.permute.xlu1 %565 }
 0x2f6   :  { %v541_v37 = vadd.f32 %v540_v36, %v539_v35 }
 0x2f8   :  { %v542_v38 = vrot.slane %v541_v37, 1 }
 0x2fa   :  { %v543_v4 = vadd.f32 %v542_v38, %v541_v37 }
 0x2fc   :  { %v569_v5 = vmul.f32 %v556_v39, %v543_v4  ;;  %v570_v41 = vmul.f32 %v561_v0, %v543_v4  ;;  %v568_v1 = vmul.f32 %v551_v34, %v543_v4  ;;  %v571_v42 = vmul.f32 %v566_v40, %v543_v4 }
 0x2fe   :  { %v573_v43 = vsub.f32 %v454_v11, %v569_v5  ;;  %v574_v44 = vsub.f32 %v455_v16, %v570_v41  ;;  %v572_v45 = vsub.f32 %v453_v18, %v568_v1  ;;  %v575_v46 = vsub.f32 %v456_v23, %v571_v42 }
 0x300   :  { %577 = vst.msk [vmem:[#allocation2 + $0x8] sm:$0xff] %vm125_vm5, %v573_v43 }
 0x301   :  { %578 = vst.msk [vmem:[#allocation2 + $0x10] sm:$0xff] %vm125_vm5, %v574_v44 }
 0x302   :  { %576 = vst.msk [vmem:[#allocation2] sm:$0xff] %vm125_vm5, %v572_v45 }
 0x303   :  { %579 = vst.msk [vmem:[#allocation2 + $0x18] sm:$0xff] %vm125_vm5, %v575_v46 }
 0x304   :  { %592 = dma.vmem_to_hbm [thread:$0]  %s585_s0, 512, %s587_s7, [#allocation3], %s680_s8, %s680_s8, %s681_s9  }
 0x305   :  { %673 = dma.done.wait [#allocation3], 512  }
 0x306   :  { %674 = vsyncadd [#allocation3], 4294966784 }
 0x307   :  { %597 = vsyncpa [#allocation3], 1 }

</bundles_post_ra>
